<compile_context>
chip_gen: v5e
topology: v5e:2x2
jax: 0.10.0
libtpu: 0.0.40
codegen_flags: <defaults>
</compile_context>

<pallas_src>
import math

import jax
import jax.numpy as jnp
from jax import lax
from jax.experimental import pallas as pl
from jax.experimental.pallas import tpu as pltpu


# ---------------------------------------------------------------------------
# VMEM budgeting / tile selection
# ---------------------------------------------------------------------------
def _vmem_limit_bytes():
    """Scoped-VMEM limit derived from the actual chip (v7x: 64 MiB physical,
    v5e/v6e: 128 MiB), leaving headroom for compiler internals."""
    cap = 64 * 1024 * 1024                      # conservative default (v7x)
    try:
        cap = int(pltpu.get_tpu_info().vmem_capacity_bytes)
    except Exception:
        pass
    return min((cap * 3) // 4, 96 * 1024 * 1024)


def _step_bytes(tile_h, W, Cs, Cx):
    """Per-grid-step VMEM working set of the fused kernel: double-buffered
    in/out blocks plus live f32 intermediates (conv, xn) plus slack."""
    npix = tile_h * W
    seg_blk = 9 * Cs * npix * 2                 # bf16 im2col patch block
    x_blk = Cx * npix * 4                       # f32 input block
    out_blk = Cx * npix * 4                     # f32 output block
    conv_live = 2 * (2 * Cx) * npix * 4         # conv value + add-chain headroom
    xn_live = Cx * npix * 4
    return 2 * (seg_blk + x_blk + out_blk) + conv_live + xn_live + (1 << 16)


def _pick_tile_h(H, W, Cs, Cx, budget_bytes):
    """Largest row tile that divides H, keeps tile_h*W a multiple of 128
    (lane-dense blocks), fits the VMEM budget and (if possible) leaves at
    least two row tiles so both TensorCores get work even at B == 1."""
    g = math.gcd(W, 128)
    step = 128 // g                             # makes tile_h*W % 128 == 0
    cands = [th for th in range(step, H + 1, step)
             if H % th == 0 and _step_bytes(th, W, Cs, Cx) <= budget_bytes]
    if not cands:
        return H                                # single tile: block == full dims
    multi = [th for th in cands if H // th >= 2]
    return max(multi) if multi else max(cands)


# ---------------------------------------------------------------------------
# InstanceNorm2d statistics: per-(batch, channel) partial sums over H*W.
# Lane-dense: blocks are (Cx, tile_h*W) with pixels on the lane axis.
# ---------------------------------------------------------------------------
def _stats_kernel(x_ref, sum_ref, ssq_ref, acc_s, acc_q):
    h = pl.program_id(1)

    @pl.when(h == 0)
    def _init():
        acc_s[...] = jnp.zeros_like(acc_s)
        acc_q[...] = jnp.zeros_like(acc_q)

    xt = x_ref[0]                                       # (Cx, tile_h*W) f32
    acc_s[...] += jnp.sum(xt, axis=1, keepdims=True)
    acc_q[...] += jnp.sum(xt * xt, axis=1, keepdims=True)

    @pl.when(h == pl.num_programs(1) - 1)
    def _finalize():
        sum_ref[0] = acc_s[...]
        ssq_ref[0] = acc_q[...]


def _instance_stats(x3, tile_h, W, vmem_limit):
    B, Cx, HW = x3.shape
    npix = tile_h * W
    n_h = HW // npix
    return pl.pallas_call(
        _stats_kernel,
        out_shape=(jax.ShapeDtypeStruct((B, Cx, 1), jnp.float32),
                   jax.ShapeDtypeStruct((B, Cx, 1), jnp.float32)),
        grid_spec=pltpu.PrefetchScalarGridSpec(
            num_scalar_prefetch=0,
            grid=(B, n_h),
            in_specs=[pl.BlockSpec((1, Cx, npix), lambda b, h: (b, 0, h))],
            out_specs=(pl.BlockSpec((1, Cx, 1), lambda b, h: (b, 0, 0)),
                       pl.BlockSpec((1, Cx, 1), lambda b, h: (b, 0, 0))),
            scratch_shapes=[pltpu.VMEM((Cx, 1), jnp.float32),
                            pltpu.VMEM((Cx, 1), jnp.float32)]),
        compiler_params=pltpu.CompilerParams(
            dimension_semantics=("parallel", "arbitrary"),
            vmem_limit_bytes=vmem_limit),
    )(x3)


# ---------------------------------------------------------------------------
# Fused SPADE kernel: one bf16 MXU matmul produces [gamma | beta] for the row
# tile, then InstanceNorm application + modulation in f32.  Everything is
# channel-major with pixels on the lane axis (lane-dense loads and stores).
# ---------------------------------------------------------------------------
def _spade_kernel(seg_ref, x_ref, mean_ref, rstd_ref, w_ref, b_ref, o_ref):
    """
    seg_ref : (1, 9*Cs, npix)  bf16 im2col segmap patches for this row tile
    x_ref   : (1, Cx, npix)    f32 input block (channel-major)
    mean_ref, rstd_ref : (1, Cx, 1) f32 InstanceNorm statistics of this batch
    w_ref   : (2*Cx, 9*Cs)     bf16 [gamma | beta] conv weights
    b_ref   : (2*Cx, 1)        f32 biases ('+1' already folded into gamma half)
    o_ref   : (1, Cx, npix)    f32 output block
    """
    cx = x_ref.shape[1]
    conv = jnp.dot(w_ref[...], seg_ref[0],
                   preferred_element_type=jnp.float32)      # (2Cx, npix) f32
    conv = conv + b_ref[...]
    gamma = conv[:cx, :]                                    # includes the +1
    beta = conv[cx:, :]
    xn = (x_ref[0] - mean_ref[0]) * rstd_ref[0]             # (Cx, npix) f32
    o_ref[0] = (xn * gamma + beta).astype(o_ref.dtype)


def spade_forward(x_nchw, segmap_nchw, params, eps=1e-5):
    """SPADE forward. x: (B, Cx, H, W), segmap: (B, Cs, H, W) -> (B, Cx, H, W)."""
    wg, bg, wb, bb = params                  # conv weights in HWIO (3,3,Cs,Cx)
    B, Cx, H, W = x_nchw.shape
    Cs = segmap_nchw.shape[1]

    vmem_limit = _vmem_limit_bytes()
    tile_h = _pick_tile_h(H, W, Cs, Cx, budget_bytes=vmem_limit // 2)
    n_h = H // tile_h
    npix = tile_h * W

    # Channel-major pixel view of x: free reshape, no transpose of the big tensor.
    x3 = x_nchw.reshape(B, Cx, H * W)

    # InstanceNorm2d (affine=False): biased mean / var per (batch, channel).
    sums, ssqs = _instance_stats(x3, tile_h, W, vmem_limit)
    n = float(H * W)
    mean = sums / n
    # NOTE: E[x^2]-mean^2 in f32; for very large H*W a Welford-style combine in
    # the stats kernel would be more robust against cancellation.
    var = jnp.maximum(ssqs / n - mean * mean, 0.0)
    rstd = lax.rsqrt(var + eps)

    # Host-side im2col of the (small) segmap in bf16.  Patch channel index is
    # (dy*3+dx)*Cs + c; the kernel then needs exactly one MXU matmul per tile
    # and only a (9*Cs, tile_h*W) block of the patches resides in VMEM.
    seg_p = jnp.pad(segmap_nchw.astype(jnp.bfloat16),
                    ((0, 0), (0, 0), (1, 1), (1, 1)))       # (B, Cs, H+2, W+2)
    taps = [seg_p[:, :, dy:dy + H, dx:dx + W]
            for dy in range(3) for dx in range(3)]
    seg_i2c = jnp.concatenate(taps, axis=1).reshape(B, 9 * Cs, H * W)

    # Fused [gamma | beta] weights (bf16) and biases (f32, +1 folded into gamma).
    w_cat = jnp.concatenate([wg, wb], axis=-1)              # (3,3,Cs,2Cx)
    wmat = jnp.transpose(w_cat, (3, 0, 1, 2)).reshape(2 * Cx, 9 * Cs)
    wmat = wmat.astype(jnp.bfloat16)
    bias = jnp.concatenate([bg + 1.0, bb]).reshape(2 * Cx, 1).astype(jnp.float32)

    out3 = pl.pallas_call(
        _spade_kernel,
        out_shape=jax.ShapeDtypeStruct((B, Cx, H * W), jnp.float32),
        grid_spec=pltpu.PrefetchScalarGridSpec(
            num_scalar_prefetch=0,
            grid=(B, n_h),
            in_specs=[
                pl.BlockSpec((1, 9 * Cs, npix), lambda b, h: (b, 0, h)),
                pl.BlockSpec((1, Cx, npix), lambda b, h: (b, 0, h)),
                pl.BlockSpec((1, Cx, 1), lambda b, h: (b, 0, 0)),
                pl.BlockSpec((1, Cx, 1), lambda b, h: (b, 0, 0)),
                pl.BlockSpec((2 * Cx, 9 * Cs), lambda b, h: (0, 0)),
                pl.BlockSpec((2 * Cx, 1), lambda b, h: (0, 0)),
            ],
            out_specs=pl.BlockSpec((1, Cx, npix), lambda b, h: (b, 0, h)),
        ),
        compiler_params=pltpu.CompilerParams(
            dimension_semantics=("parallel", "parallel"),
            vmem_limit_bytes=vmem_limit),
    )(seg_i2c, x3, mean, rstd, wmat, bias)

    return out3.reshape(B, Cx, H, W)


def init_spade_params(key, x_nc, segmap_nc):
    """PyTorch-default (kaiming-uniform-style) init for the two 3x3 convs."""
    k1, k2, k3, k4 = jax.random.split(key, 4)

    def conv_init(kw, kb):
        fan_in = segmap_nc * 9
        bound = fan_in ** -0.5
        # PyTorch weight layout (x_nc, segmap_nc, 3, 3) -> HWIO (3, 3, Cs, Cx)
        w_oihw = jax.random.uniform(kw, (x_nc, segmap_nc, 3, 3), jnp.float32,
                                    -bound, bound)
        w_hwio = jnp.transpose(w_oihw, (2, 3, 1, 0))
        b = jax.random.uniform(kb, (x_nc,), jnp.float32, -bound, bound)
        return w_hwio, b

    wg, bg = conv_init(k1, k2)   # mlp_gamma
    wb, bb = conv_init(k3, k4)   # mlp_beta
    return wg, bg, wb, bb


def _reference(x, segmap, params, eps=1e-5, conv_dtype=jnp.float32):
    """Pure-JAX SPADE reference.  conv_dtype=bfloat16 mirrors the kernel's
    bf16 MXU operands (f32 accumulation); float32 is the exact module."""
    wg, bg, wb, bb = params
    mean = x.mean(axis=(2, 3), keepdims=True)
    var = x.var(axis=(2, 3), keepdims=True)       # biased, like InstanceNorm2d
    xn = (x - mean) * lax.rsqrt(var + eps)
    dn = ("NCHW", "HWIO", "NCHW")
    s = segmap.astype(conv_dtype)

    def conv(w, b):
        y = lax.conv_general_dilated(s, w.astype(conv_dtype), (1, 1), "SAME",
                                     dimension_numbers=dn,
                                     preferred_element_type=jnp.float32)
        return y + b[None, :, None, None]

    gamma = conv(wg, bg)
    beta = conv(wb, bb)
    return xn * (gamma + 1.0) + beta


if __name__ == "__main__":
    B, x_nc, seg_nc, H, W = 2, 8, 4, 16, 16

    key = jax.random.PRNGKey(0)
    kx, ks, kp = jax.random.split(key, 3)
    x = jax.random.normal(kx, (B, x_nc, H, W), jnp.float32)
    segmap = jax.random.normal(ks, (B, seg_nc, H, W), jnp.float32)
    params = init_spade_params(kp, x_nc, seg_nc)

    out = jax.block_until_ready(spade_forward(x, segmap, params))
    assert out.shape == (B, x_nc, H, W)

    # Tight check against a reference that mirrors the kernel's bf16 conv
    # operands (the only deviation from exact f32 semantics).
    ref_bf16 = _reference(x, segmap, params, conv_dtype=jnp.bfloat16)
    assert jnp.allclose(out, ref_bf16, atol=1e-3, rtol=1e-3), \
        float(jnp.max(jnp.abs(out - ref_bf16)))
    # Sanity check against the exact f32 module (bounds bf16 quantization).
    ref_f32 = _reference(x, segmap, params, conv_dtype=jnp.float32)
    assert jnp.allclose(out, ref_f32, atol=6e-2, rtol=6e-2), \
        float(jnp.max(jnp.abs(out - ref_f32)))

    print("KERNEL_OK")
</pallas_src>

<mosaic_0001>
module attributes {stable_mosaic.version = 11 : i64} {
  func.func @_stats_kernel(%arg0: i32, %arg1: i32, %arg2: memref<1x8x128xf32, #tpu.memory_space<vmem>>, %arg3: memref<1x8x1xf32, #tpu.memory_space<vmem>>, %arg4: memref<1x8x1xf32, #tpu.memory_space<vmem>>, %arg5: memref<8x1xf32, #tpu.memory_space<vmem>>, %arg6: memref<8x1xf32, #tpu.memory_space<vmem>>) attributes {dimension_semantics = [#tpu.dimension_semantics<parallel>, #tpu.dimension_semantics<arbitrary>], iteration_bounds = array<i64: 2, 2>, scalar_prefetch = 0 : i64, scratch_operands = 2 : i64, tpu.core_type = #tpu.core_type<tc>, window_params = [{transform_indices = @transform_0, window_bounds = array<i64: 1, 8, 128>}, {transform_indices = @transform_1, window_bounds = array<i64: 1, 8, 1>}, {transform_indices = @transform_2, window_bounds = array<i64: 1, 8, 1>}]} {
    %c0_i32 = arith.constant 0 : i32
    %0 = arith.cmpi eq, %arg1, %c0_i32 : i32
    %1 = arith.extui %0 : i1 to i32
    %c0_i32_0 = arith.constant 0 : i32
    %2 = arith.cmpi ne, %1, %c0_i32_0 : i32
    scf.if %2 {
      %cst_13 = arith.constant 0.000000e+00 : f32
      %19 = vector.broadcast %cst_13 : f32 to vector<8x1xf32>
      %c0_14 = arith.constant 0 : index
      %c0_15 = arith.constant 0 : index
      %20 = vector.load %arg5[%c0_14, %c0_15] : memref<8x1xf32, #tpu.memory_space<vmem>>, vector<8x1xf32>
      tpu.vector_store %arg5[%c0_14, %c0_15], %19 {strides = array<i32>} : memref<8x1xf32, #tpu.memory_space<vmem>>, vector<8x1xf32>,
      %cst_16 = arith.constant 0.000000e+00 : f32
      %21 = vector.broadcast %cst_16 : f32 to vector<8x1xf32>
      %c0_17 = arith.constant 0 : index
      %c0_18 = arith.constant 0 : index
      %22 = vector.load %arg6[%c0_17, %c0_18] : memref<8x1xf32, #tpu.memory_space<vmem>>, vector<8x1xf32>
      tpu.vector_store %arg6[%c0_17, %c0_18], %21 {strides = array<i32>} : memref<8x1xf32, #tpu.memory_space<vmem>>, vector<8x1xf32>,
    } else {
    }
    %c0 = arith.constant 0 : index
    %c0_1 = arith.constant 0 : index
    %c0_2 = arith.constant 0 : index
    %3 = vector.load %arg2[%c0, %c0_1, %c0_2] : memref<1x8x128xf32, #tpu.memory_space<vmem>>, vector<1x8x128xf32>
    %4 = vector.shape_cast %3 : vector<1x8x128xf32> to vector<8x128xf32>
    %c0_3 = arith.constant 0 : index
    %c0_4 = arith.constant 0 : index
    %5 = vector.load %arg5[%c0_3, %c0_4] : memref<8x1xf32, #tpu.memory_space<vmem>>, vector<8x1xf32>
    %cst = arith.constant dense<0.000000e+00> : vector<8xf32>
    %6 = vector.multi_reduction <add>, %4, %cst [1] : vector<8x128xf32> to vector<8xf32>
    %7 = vector.shape_cast %6 : vector<8xf32> to vector<8x1xf32>
    %8 = arith.addf %5, %7 : vector<8x1xf32>
    %c0_5 = arith.constant 0 : index
    %c0_6 = arith.constant 0 : index
    %9 = vector.load %arg5[%c0_5, %c0_6] : memref<8x1xf32, #tpu.memory_space<vmem>>, vector<8x1xf32>
    tpu.vector_store %arg5[%c0_5, %c0_6], %8 {strides = array<i32>} : memref<8x1xf32, #tpu.memory_space<vmem>>, vector<8x1xf32>,
    %c0_7 = arith.constant 0 : index
    %c0_8 = arith.constant 0 : index
    %10 = vector.load %arg6[%c0_7, %c0_8] : memref<8x1xf32, #tpu.memory_space<vmem>>, vector<8x1xf32>
    %11 = arith.mulf %4, %4 : vector<8x128xf32>
    %cst_9 = arith.constant dense<0.000000e+00> : vector<8xf32>
    %12 = vector.multi_reduction <add>, %11, %cst_9 [1] : vector<8x128xf32> to vector<8xf32>
    %13 = vector.shape_cast %12 : vector<8xf32> to vector<8x1xf32>
    %14 = arith.addf %10, %13 : vector<8x1xf32>
    %c0_10 = arith.constant 0 : index
    %c0_11 = arith.constant 0 : index
    %15 = vector.load %arg6[%c0_10, %c0_11] : memref<8x1xf32, #tpu.memory_space<vmem>>, vector<8x1xf32>
    tpu.vector_store %arg6[%c0_10, %c0_11], %14 {strides = array<i32>} : memref<8x1xf32, #tpu.memory_space<vmem>>, vector<8x1xf32>,
    %c1_i32 = arith.constant 1 : i32
    %16 = arith.cmpi eq, %arg1, %c1_i32 : i32
    %17 = arith.extui %16 : i1 to i32
    %c0_i32_12 = arith.constant 0 : i32
    %18 = arith.cmpi ne, %17, %c0_i32_12 : i32
    scf.if %18 {
      %c0_13 = arith.constant 0 : index
      %c0_14 = arith.constant 0 : index
      %19 = vector.load %arg5[%c0_13, %c0_14] : memref<8x1xf32, #tpu.memory_space<vmem>>, vector<8x1xf32>
      %c0_15 = arith.constant 0 : index
      %c0_16 = arith.constant 0 : index
      %c0_17 = arith.constant 0 : index
      %20 = vector.load %arg3[%c0_15, %c0_16, %c0_17] : memref<1x8x1xf32, #tpu.memory_space<vmem>>, vector<1x8x1xf32>
      %21 = vector.shape_cast %20 : vector<1x8x1xf32> to vector<8x1xf32>
      %22 = vector.shape_cast %19 : vector<8x1xf32> to vector<1x8x1xf32>
      tpu.vector_store %arg3[%c0_15, %c0_16, %c0_17], %22 {strides = array<i32>} : memref<1x8x1xf32, #tpu.memory_space<vmem>>, vector<1x8x1xf32>,
      %c0_18 = arith.constant 0 : index
      %c0_19 = arith.constant 0 : index
      %23 = vector.load %arg6[%c0_18, %c0_19] : memref<8x1xf32, #tpu.memory_space<vmem>>, vector<8x1xf32>
      %c0_20 = arith.constant 0 : index
      %c0_21 = arith.constant 0 : index
      %c0_22 = arith.constant 0 : index
      %24 = vector.load %arg4[%c0_20, %c0_21, %c0_22] : memref<1x8x1xf32, #tpu.memory_space<vmem>>, vector<1x8x1xf32>
      %25 = vector.shape_cast %24 : vector<1x8x1xf32> to vector<8x1xf32>
      %26 = vector.shape_cast %23 : vector<8x1xf32> to vector<1x8x1xf32>
      tpu.vector_store %arg4[%c0_20, %c0_21, %c0_22], %26 {strides = array<i32>} : memref<1x8x1xf32, #tpu.memory_space<vmem>>, vector<1x8x1xf32>,
    } else {
    }
    return
  }
  func.func @transform_0(%arg0: i32, %arg1: i32) -> (i32, i32, i32) {
    %c0_i32 = arith.constant 0 : i32
    %c0_i32_0 = arith.constant 0 : i32
    return %arg0, %c0_i32, %arg1 : i32, i32, i32
  }
  func.func @transform_1(%arg0: i32, %arg1: i32) -> (i32, i32, i32) {
    %c0_i32 = arith.constant 0 : i32
    %c0_i32_0 = arith.constant 0 : i32
    %c0_i32_1 = arith.constant 0 : i32
    return %arg0, %c0_i32, %c0_i32_0 : i32, i32, i32
  }
  func.func @transform_2(%arg0: i32, %arg1: i32) -> (i32, i32, i32) {
    %c0_i32 = arith.constant 0 : i32
    %c0_i32_0 = arith.constant 0 : i32
    %c0_i32_1 = arith.constant 0 : i32
    return %arg0, %c0_i32, %c0_i32_0 : i32, i32, i32
  }
}

</mosaic_0001>

<bundles_post_ra>
// kernel: tpu_custom_call.1
= control target key start
LH: loop header
LB: loop body
LE: loop exit
PB: predicated region body
PF: predicated region fallthrough
CT: control target
= control target key end

     0   :  { %8 = vsyncpa [#allocation5], 0  ;;  %s644_s0 = inlined_call_operand.hbm [shape: f32[2,8,256], index: 0, kind: input, shape index: {}]   ;;  %s645_s1 = inlined_call_operand.vmem [shape: f32[2,8,1], index: 1, kind: output, shape index: {0}]   ;;  %s646_s2 = inlined_call_operand.vmem [shape: f32[2,8,1], index: 2, kind: output, shape index: {1}]  }
   0x1   :  { %10 = vsyncpa [#allocation5 + $0x1], 0  ;;  %s526_s9 = smov 0   ;;  %s528_s10 = smov 0  }
   0x2   :  { %s530_s11 = smov 0   ;;  %s532_s12 = smov 0  }
   0x3   :  { %s534_s13 = smov 0   ;;  %s536_s14 = smov 0  }
   0x4   :  { %s538_s15 = smov 0   ;;  %s540_s16 = smov 0  }
   0x5 LB: > { %s325_s17 = sadd.s32 4294967295, %s508_s16   ;;  %s25_s18 = sadd.s32 1, %s500_s14  ;;  %s508_s16 = sphi %s540_s16, %s16_s16   ;;  %s504_s15 = sphi %s538_s15, %s655_s15   ;;  %s500_s14 = sphi %s536_s14, %s654_s14   ;;  %s496_s13 = sphi %s534_s13, %s653_s13   ;;  %s492_s12 = sphi %s532_s12, %s652_s12   ;;  %s488_s11 = sphi %s530_s11, %s651_s11   ;;  %s484_s10 = sphi %s528_s10, %s650_s10   ;;  %s480_s9 = sphi %s526_s9, %s649_s9  }
   0x6   : > { %p26_p0 = scmp.ge.s32.totalorder %s25_s18, 2  ;;  %s28_s19 = sadd.s32 1, %s504_s15 }
   0x7   : > { %s37_s20 = sadd.s32 1, %s488_s11  ;;  %p44_p1 = scmp.ne.s32.totalorder %s488_s11, %s484_s10 }
   0x8   : > { %s657_s18 = smov (%p26_p0, %s25_s18), 0  ;;  %s659_s19 = smov (!%p26_p0, %s28_s19), %s504_s15 }
   0x9   : > { %s33_s21 = ssub.s32 %s500_s14, %s657_s18  ;;  %p45_p2 = scmp.eq.s32.totalorder %s508_s16, 0 }
   0xa   : > { %p30_p3 = scmp.ge.s32.totalorder %s659_s19, 2  ;;  %p50_p4 = scmp.ne.s32.totalorder %s484_s10, %s480_s9 }
   0xb   : > { %p577_p5 = por %p45_p2, %p44_p1  ;;  %p51_p6 = scmp.eq.s32.totalorder %s325_s17, 0 }
   0xc   : > { %s661_s19 = smov (%p30_p3, %s659_s19), 0  ;;  %p346_p8 = scmp.lt.s32.totalorder %s508_s16, 4 }
   0xd   : > { %p583_p7 = por %p51_p6, %p50_p4  ;;  %s32_s24 = ssub.s32 %s504_s15, %s661_s19 }
   0xe   : > { %s34_s25 = sor.u32 %s33_s21, %s32_s24  ;;  %s126_s26 = sand.u32 1, %s488_s11  }
   0xf   : > { %p35_p9 = scmp.eq.s32.totalorder %s34_s25, 0  ;;  %s329_s27 = sshll.u32 %s126_s26, 3 }
  0x10   : > { %s330_s28 = sshll.u32 %s504_s15, 1  ;;  %s130_s4 = scalar_lea.vmem [#allocation4], %s329_s27 }
  0x11   : > { %s593_s29 = scalar_select %p35_p9, %s488_s11, %s37_s20  }
  0x12   : > { %s134_s30 = sadd.s32 %s500_s14, %s330_s28  ;;  %s140_s5 = sshll.u32 %s130_s4, 4  ;;  %s141_s5 = int_to_ptr.vmem [resolvable:$true] %s140_s5 }
  0x13   : > { %s331_s3 = sshll.u32 %s134_s30, 3  ;;  %p343_p10 = pnand %p346_p8, %p577_p5 }
  0x14   : > { %s136_s8 = scalar_lea.hbm %s644_s0, %s331_s3  ;;  %p332_p11 = scmp.ge.s32.totalorder %s508_s16, 1 }
  0x15   : > { %s138_s9 = sshll.u32 %s136_s8, 4  ;;  %p145_p12 = scmp.lt.s32.totalorder %s508_s16, 5  ;;  %s139_s9 = int_to_ptr.hbm [resolvable:$true] %s138_s9 }
  0x16   : > { %s127_s17 = scalar_lea.sflag [#allocation5], %s126_s26 }
  0x17   : > { %345 = dma.hbm_to_vmem [thread:$0]  (!%p343_p10), %s139_s9, 128, %s141_s5, %s127_s17  }
  0x18   : > { %p146_p13 = pnand %p332_p11, %p145_p12 }
  0x19   : > { %s151_s20 = sand.u32 (!%p146_p13), 1, %s484_s10  }
  0x1a   : > { %149 = sbr.rel (%p146_p13) target bundleno = 178 (0xb2), region = 24  ;;  %s333_s21 = sshll.u32 (!%p146_p13), %s151_s20, 3 }
  0x1b   : > { %s152_s24 = scalar_lea.sflag (!%p146_p13), [#allocation5], %s151_s20  ;;  %s155_s25 = scalar_lea.vmem (!%p146_p13), [#allocation4], %s333_s21 }
  0x1f   : > { %475 = dma.done.wait (%p583_p7), %s152_s24, 128  }
  0x20   : > { %477 = vsyncadd (%p583_p7), %s152_s24, 4294967168  ;;  %p180_p0 = scmp.lt.s32.totalorder %s496_s13, 1  ;;  %p336_p1 = scmp.ne.s32.totalorder %s492_s12, 0 }
  0x22   : > { %s663_s13 = smov (!%p180_p0, %s496_s13), 1  ;;  %191 = sbr.rel (%p336_p1) target bundleno = 42 (0x2a), region = 32 }
  0x23   : > { %s334_s22 = sshll.u32 %s663_s13, 3 }
  0x24   : > { %s183_s28 = scalar_lea.vmem %s645_s1, %s334_s22  ;;  %s187_s4 = scalar_lea.vmem %s646_s2, %s334_s22 }
  0x27   : > { %vm192_vm0 = vcmask 7168   ;;  %v510_v0 = vmov 0.0  }
  0x28   : > { %193 = vst.msk [vmem:[#allocation2] sm:$0xff] %vm192_vm0, %v510_v0 }
  0x29   : > { %194 = vst.msk [vmem:[#allocation3] sm:$0xff] %vm192_vm0, %v510_v0 }
  0x2a PF: > { %v195_v1 = vld [vmem:[%s155_s25] sm:$0xff]  ;;  %vm200_vm1 = vcmask 7168   ;;  %p337_p2 = scmp.ne.s32.totalorder %s492_s12, 1 }
  0x2b   : > { %197 = vadd.xlane.f32.xlu0 %v195_v1  ;;  %v203_v2 = vmul.f32 %v195_v1, %v195_v1 }
  0x2f   : > { %v196_v3 = vld [vmem:[#allocation2] sm:$0xff] }
  0x30   : > { %v202_v6 = vld [vmem:[#allocation3] sm:$0xff] }
  0x33   : > { %204 = vadd.xlane.f32.xlu0 %v203_v2 }
  0x9e   : > { %v198_v4 = vpop.xlane.xlu0 %197 }
  0x9f   : > { %v199_v5 = vadd.f32 %v198_v4, %v196_v3 }
  0xa1   : > { %201 = vst.msk [vmem:[#allocation2] sm:$0xff] %vm200_vm1, %v199_v5 }
  0xa5   : > { %211 = sbr.rel (%p337_p2) target bundleno = 178 (0xb2), region = 36 }
  0xa6   : > { %v205_v7 = vpop.xlane.xlu0 %204 }
  0xa7   : > { %v206_v8 = vadd.f32 %v205_v7, %v202_v6 }
  0xa9   : > { %207 = vst.msk [vmem:[#allocation3] sm:$0xff] %vm200_vm1, %v206_v8 }
  0xaa   : > { %v212_v9 = vld [vmem:[#allocation2] sm:$0xff] }
  0xab   : > { %213 = vst.msk [vmem:[%s183_s28] sm:$0xff] %vm200_vm1, %v212_v9 }
  0xb0   : > { %v214_v10 = vld [vmem:[#allocation3] sm:$0xff] }
  0xb1   : > { %215 = vst.msk [vmem:[%s187_s4] sm:$0xff] %vm200_vm1, %v214_v10 }
  0xb2 PF: > { %s16_s16 = sadd.s32 1, %s508_s16   ;;  %s649_s9 = smov %s484_s10 }
  0xb3   : > { %p13_p3 = scmp.ge.s32.totalorder %s16_s16, 6   ;;  %s650_s10 = smov %s488_s11 }
  0xb4   : > { %s651_s11 = smov %s593_s29  ;;  %s652_s12 = smov %s500_s14 }
  0xb5   : > { %s653_s13 = smov %s504_s15  ;;  %s654_s14 = smov %s657_s18 }
  0xb6   : > { %s655_s15 = smov %s661_s19  ;;  %15 = sbr.rel (!%p13_p3) target bundleno = 5 (0x5), region = 84 }
  0xbb   :  { %249 = vsyncpa [#allocation5], 1 }
  0xbc   :  { %251 = vsyncpa [#allocation5 + $0x1], 1 }

</bundles_post_ra>
